<compile_context>
chip_gen: v7x
topology: tpu7x:2x2x1
jax: 0.10.0
libtpu: 0.0.40
codegen_flags: <defaults>
</compile_context>

<pallas_src>
import jax
import jax.numpy as jnp
from jax.experimental import pallas as pl
from jax.experimental.pallas import tpu as pltpu

_LANE = 128
_SUBLANE = 8


def _fbn_kernel(x_ref, scale_ref, shift_ref, o_ref):
    # Elementwise hot path: x * scale - shift, f32 math, cast to output dtype.
    x = x_ref[...].astype(jnp.float32)           # (tile_n, tile_d)
    o_ref[...] = (x * scale_ref[...] - shift_ref[...]).astype(o_ref.dtype)


def _round_up(a, b):
    return -(-a // b) * b


def full_batch_norm(x, var, mean):
    """Pallas equivalent of FullBatchNorm(var, mean)(x).

    x:    (..., D) array
    var:  (D,)     precomputed per-feature variance
    mean: (D,)     precomputed per-feature mean
    """
    orig_shape = x.shape
    D = orig_shape[-1]
    if x.ndim != 2:
        x = x.reshape(-1, D)
    N = x.shape[0]

    # --- stat preprocessing (f32, like the PyTorch buffers) ------------------
    inv_std = 1.0 / jnp.sqrt(var.astype(jnp.float32) + 1e-5)     # (D,)
    scale = inv_std                                              # (D,)
    shift = mean.astype(jnp.float32) * inv_std                   # (D,)

    dtype_bytes = jnp.dtype(x.dtype).itemsize
    row_mult = max(_SUBLANE, 32 // dtype_bytes)   # sublane packing: f32=8, bf16=16, int8=32

    # --- generation-aware VMEM budget ----------------------------------------
    try:
        vmem_cap = int(pltpu.get_tpu_info().vmem_capacity_bytes)
    except Exception:
        vmem_cap = 64 * 1024 * 1024               # conservative (v7x per-core VMEM)
    # Double-buffered in + out ~= 4x block; keep comfortably inside scoped VMEM.
    block_budget = min(8 * 1024 * 1024, vmem_cap // 16)

    # --- lane-dense repack for tiny feature dims ------------------------------
    repacked = False
    repack_n = N
    if D % _LANE != 0 and _LANE % D == 0:
        # Repack (N, D) -> (N*D/128, 128); pad at most 128/D - 1 rows.
        reps = _LANE // D
        repack_n = _round_up(N, reps)
        if repack_n != N:
            x = jnp.pad(x, ((0, repack_n - N), (0, 0)))
        rows = (repack_n * D) // _LANE
        x = x.reshape(rows, _LANE)
        scale = jnp.tile(scale, reps)
        shift = jnp.tile(shift, reps)
        d = _LANE
        repacked = True
    else:
        rows, d = N, D

    d_pad = _round_up(d, _LANE)

    # --- tile selection: prefer full-width feature tiles ----------------------
    if row_mult * d_pad * dtype_bytes <= block_budget:
        tile_d = d_pad                                    # one contiguous row strip
    else:
        tile_d = max(_LANE,
                     (block_budget // (row_mult * dtype_bytes)) // _LANE * _LANE)
    num_d_blocks = pl.cdiv(d, tile_d)

    max_tile_n = max(row_mult,
                     (block_budget // (tile_d * dtype_bytes)) // row_mult * row_mult)
    if rows <= row_mult:
        tile_n = rows                                     # single tiny block (full dim)
    else:
        # Aim for >= 2 row blocks so v7x's 2 TensorCores both get work.
        half = _round_up(_round_up(rows, row_mult) // 2, row_mult)
        tile_n = min(max_tile_n, half)
    num_row_blocks = pl.cdiv(rows, tile_n)

    # --- pad only the tiny stats vectors (scale=1 / shift=0 keep pads inert) --
    stats_len = num_d_blocks * tile_d
    if stats_len != d:
        scale = jnp.pad(scale, (0, stats_len - d), constant_values=1.0)
        shift = jnp.pad(shift, (0, stats_len - d))
    scale2 = scale.reshape(1, stats_len).astype(jnp.float32)
    shift2 = shift.reshape(1, stats_len).astype(jnp.float32)

    # --- grid / specs ----------------------------------------------------------
    if num_d_blocks == 1:
        grid = (num_row_blocks,)
        in_specs = [
            pl.BlockSpec((tile_n, tile_d), lambda i: (i, 0)),
            pl.BlockSpec((1, tile_d), lambda i: (0, 0)),
            pl.BlockSpec((1, tile_d), lambda i: (0, 0)),
        ]
        out_specs = pl.BlockSpec((tile_n, tile_d), lambda i: (i, 0))
        dims = ("parallel",)
    else:
        # D blocks outermost -> scale/shift block index constant along the inner
        # (row) axis, so the stats are not re-DMA'd every grid step.
        grid = (num_d_blocks, num_row_blocks)
        in_specs = [
            pl.BlockSpec((tile_n, tile_d), lambda j, i: (i, j)),
            pl.BlockSpec((1, tile_d), lambda j, i: (0, j)),
            pl.BlockSpec((1, tile_d), lambda j, i: (0, j)),
        ]
        out_specs = pl.BlockSpec((tile_n, tile_d), lambda j, i: (i, j))
        dims = ("parallel", "parallel")

    block_bytes = tile_n * tile_d * dtype_bytes
    footprint = 4 * block_bytes + 4 * tile_d * 4 * 2     # 2x-buffered x/out + stats
    vmem_limit = int(min(vmem_cap // 2, max(footprint + (4 << 20), 16 << 20)))

    out = pl.pallas_call(
        _fbn_kernel,
        out_shape=jax.ShapeDtypeStruct((rows, d), x.dtype),
        grid_spec=pltpu.PrefetchScalarGridSpec(
            num_scalar_prefetch=0,
            grid=grid,
            in_specs=in_specs,
            out_specs=out_specs,
        ),
        compiler_params=pltpu.CompilerParams(
            dimension_semantics=dims,
            vmem_limit_bytes=vmem_limit,
        ),
    )(x, scale2, shift2)

    # --- undo repack / restore original shape ---------------------------------
    if repacked:
        out = out.reshape(repack_n, D)
        if repack_n != N:
            out = out[:N]
    return out.reshape(orig_shape)


if __name__ == "__main__":
    key = jax.random.PRNGKey(0)
    kx, kv, km = jax.random.split(key, 3)

    def ref_fn(x, var, mean):
        inv_std = 1.0 / jnp.sqrt(var.astype(jnp.float32) + 1e-5)
        return (x - mean[None, :]) * inv_std[None, :]

    # Case 1: small hidden (D=32) -> lane-dense repack path.
    N, D = 8, 32
    x = jax.random.normal(kx, (N, D), dtype=jnp.float32)
    var = jax.random.uniform(kv, (D,), dtype=jnp.float32, minval=0.5, maxval=2.0)
    mean = jax.random.normal(km, (D,), dtype=jnp.float32)
    out = jax.block_until_ready(full_batch_norm(x, var, mean))
    assert jnp.allclose(out, ref_fn(x, var, mean), atol=1e-5, rtol=1e-5), "mismatch (D=32)"

    # Case 2: D multiple of 128 -> full-width row-strip path, 2 row blocks.
    N2, D2 = 16, 256
    x2 = jax.random.normal(kx, (N2, D2), dtype=jnp.float32)
    var2 = jax.random.uniform(kv, (D2,), dtype=jnp.float32, minval=0.5, maxval=2.0)
    mean2 = jax.random.normal(km, (D2,), dtype=jnp.float32)
    out2 = jax.block_until_ready(full_batch_norm(x2, var2, mean2))
    assert jnp.allclose(out2, ref_fn(x2, var2, mean2), atol=1e-5, rtol=1e-5), "mismatch (D=256)"

    # Case 3: ragged rows and features (N=20, D=96) -> Pallas edge-masking path,
    # no wrapper-side padding of x.
    N3, D3 = 20, 96
    x3 = jax.random.normal(kx, (N3, D3), dtype=jnp.float32)
    var3 = jax.random.uniform(kv, (D3,), dtype=jnp.float32, minval=0.5, maxval=2.0)
    mean3 = jax.random.normal(km, (D3,), dtype=jnp.float32)
    out3 = jax.block_until_ready(full_batch_norm(x3, var3, mean3))
    assert jnp.allclose(out3, ref_fn(x3, var3, mean3), atol=1e-5, rtol=1e-5), "mismatch (D=96)"

    print("KERNEL_OK")
</pallas_src>

<mosaic_0001>
module attributes {stable_mosaic.version = 11 : i64} {
  func.func @_fbn_kernel(%arg0: i32, %arg1: memref<2x128xf32, #tpu.memory_space<vmem>>, %arg2: memref<1x128xf32, #tpu.memory_space<vmem>>, %arg3: memref<1x128xf32, #tpu.memory_space<vmem>>, %arg4: memref<2x128xf32, #tpu.memory_space<vmem>>) attributes {dimension_semantics = [#tpu.dimension_semantics<parallel>], iteration_bounds = array<i64: 1>, scalar_prefetch = 0 : i64, scratch_operands = 0 : i64, tpu.core_type = #tpu.core_type<tc>, window_params = [{transform_indices = @transform_0, window_bounds = array<i64: 2, 128>}, {pipeline_mode = #tpu.pipeline_mode<synchronous>, transform_indices = @transform_1, window_bounds = array<i64: 1, 128>}, {pipeline_mode = #tpu.pipeline_mode<synchronous>, transform_indices = @transform_2, window_bounds = array<i64: 1, 128>}, {transform_indices = @transform_3, window_bounds = array<i64: 2, 128>}]} {
    %c0 = arith.constant 0 : index
    %c0_0 = arith.constant 0 : index
    %0 = vector.load %arg1[%c0, %c0_0] : memref<2x128xf32, #tpu.memory_space<vmem>>, vector<2x128xf32>
    %c0_1 = arith.constant 0 : index
    %c0_2 = arith.constant 0 : index
    %1 = vector.load %arg2[%c0_1, %c0_2] : memref<1x128xf32, #tpu.memory_space<vmem>>, vector<1x128xf32>
    %2 = vector.broadcast %1 : vector<1x128xf32> to vector<2x128xf32>
    %3 = arith.mulf %0, %2 : vector<2x128xf32>
    %c0_3 = arith.constant 0 : index
    %c0_4 = arith.constant 0 : index
    %4 = vector.load %arg3[%c0_3, %c0_4] : memref<1x128xf32, #tpu.memory_space<vmem>>, vector<1x128xf32>
    %5 = vector.broadcast %4 : vector<1x128xf32> to vector<2x128xf32>
    %6 = arith.subf %3, %5 : vector<2x128xf32>
    %c0_5 = arith.constant 0 : index
    %c0_6 = arith.constant 0 : index
    %7 = vector.load %arg4[%c0_5, %c0_6] : memref<2x128xf32, #tpu.memory_space<vmem>>, vector<2x128xf32>
    tpu.vector_store %arg4[%c0_5, %c0_6], %6 {strides = array<i32>} : memref<2x128xf32, #tpu.memory_space<vmem>>, vector<2x128xf32>,
    return
  }
  func.func @transform_0(%arg0: i32) -> (i32, i32) {
    %c0_i32 = arith.constant 0 : i32
    %c0_i32_0 = arith.constant 0 : i32
    return %arg0, %c0_i32 : i32, i32
  }
  func.func @transform_1(%arg0: i32) -> (i32, i32) {
    %c0_i32 = arith.constant 0 : i32
    %c0_i32_0 = arith.constant 0 : i32
    %c0_i32_1 = arith.constant 0 : i32
    return %c0_i32, %c0_i32_0 : i32, i32
  }
  func.func @transform_2(%arg0: i32) -> (i32, i32) {
    %c0_i32 = arith.constant 0 : i32
    %c0_i32_0 = arith.constant 0 : i32
    %c0_i32_1 = arith.constant 0 : i32
    return %c0_i32, %c0_i32_0 : i32, i32
  }
  func.func @transform_3(%arg0: i32) -> (i32, i32) {
    %c0_i32 = arith.constant 0 : i32
    %c0_i32_0 = arith.constant 0 : i32
    return %arg0, %c0_i32 : i32, i32
  }
}

</mosaic_0001>

<bundles_post_ra>
// kernel: tpu_custom_call.1
= control target key start
LH: loop header
LB: loop body
LE: loop exit
PB: predicated region body
PF: predicated region fallthrough
CT: control target
= control target key end

     0   :  { %8 = vsyncpa [#allocation3], 0  ;;  %s164_s0 = inlined_call_operand.hbm [shape: f32[2,128], index: 0, kind: input, shape index: {}]   ;;  %s165_s1 = inlined_call_operand.vmem [shape: f32[1,128], index: 1, kind: input, shape index: {}]   ;;  %s166_s2 = inlined_call_operand.vmem [shape: f32[1,128], index: 2, kind: input, shape index: {}]   ;;  %s167_s3 = inlined_call_operand.hbm [shape: f32[2,128], index: 3, kind: output, shape index: {}]  }
   0x1   :  { %9 = vsyncpa [#allocation4], 0  ;;  %s112_s12 = smov [#allocation2]   ;;  %s64_s16 = scalar_lea.hbm %s164_s0, 32 }
   0x2   :  { %s16_s13 = sshll.u32 %s112_s12, 4  ;;  %p65_p0 = scmp.ne.s32.totalorder %s164_s0, %s64_s16  ;;  %s17_s13 = int_to_ptr.vmem [resolvable:$true] %s16_s13 }
   0x3   :  { %p68_p1 = scmp.lt.u32.totalorder %s64_s16, %s164_s0 }
   0x5   :  { %p70_p2 = pnand %p68_p1, %p65_p0 }
   0x7   :  { %73 = shalt.err (!%p70_p2)
}
   0x8   :  { %s74_s21 = scalar_lea.vmem %s17_s13, 32  ;;  %p79_p4 = scmp.lt.s32.totalorder %s17_s13, %s17_s13 }
   0x9   :  { %p75_p3 = scmp.ne.s32.totalorder %s17_s13, %s74_s21  ;;  %p80_p5 = scmp.lt.s32.totalorder %s74_s21, %s74_s21 }
   0xb   :  { %p81_p6 = por %p80_p5, %p79_p4 }
   0xd   :  { %p82_p7 = pnand %p81_p6, %p75_p3 }
   0xf   :  { %85 = shalt.err (!%p82_p7)
}
  0x10   :  { %19 = dma.hbm_to_vmem [thread:$0]  %s164_s0, 32, %s17_s13, [#allocation3]  }
  0x11   :  { %108 = dma.done.wait [#allocation3], 32  }
  0x12   :  { %109 = vsyncadd [#allocation3], 4294967264  ;;  %s113_s24 = smov [#allocation5]   ;;  %v27_v0 = vld [vmem:[#allocation2] sm:$0x3] }
  0x13   :  { %s51_s25 = sshll.u32 %s113_s24, 4  ;;  %v60_v1 = vld [vmem:[%s165_s1] ss:$0 sm:$0xff]  ;;  %s52_s25 = int_to_ptr.vmem [resolvable:$true] %s51_s25 }
  0x14   :  { %v61_v2 = vld [vmem:[%s166_s2] ss:$0 sm:$0xff]  ;;  %v35_v3 = vmul.f32 %v60_v1, %v27_v0  ;;  %s86_s30 = scalar_lea.vmem %s52_s25, 32  ;;  %p91_p9 = scmp.lt.s32.totalorder %s52_s25, %s52_s25 }
  0x15   :  { %p87_p8 = scmp.ne.s32.totalorder %s52_s25, %s86_s30  ;;  %p92_p10 = scmp.lt.s32.totalorder %s86_s30, %s86_s30 }
  0x16   :  { %v43_v4 = vsub.f32 %v35_v3, %v61_v2 }
  0x17   :  { %p93_p11 = por %p92_p10, %p91_p9 }
  0x18   :  { %44 = vst [vmem:[#allocation5] sm:$0x3] %v43_v4 }
  0x19   :  { %p94_p12 = pnand %p93_p11, %p87_p8 }
  0x1b   :  { %97 = shalt.err (!%p94_p12)
}
  0x1c   :  { %s98_s5 = scalar_lea.hbm %s167_s3, 32 }
  0x1d   :  { %p99_p13 = scmp.ne.s32.totalorder %s167_s3, %s98_s5  ;;  %p102_p0 = scmp.lt.u32.totalorder %s98_s5, %s167_s3 }
  0x1f   :  { %p104_p1 = pnand %p102_p0, %p99_p13 }
  0x21   :  { %107 = shalt.err (!%p104_p1)
}
  0x22   :  { %54 = dma.vmem_to_hbm [thread:$0]  %s52_s25, 32, %s167_s3, [#allocation4]  }
  0x23   :  { %110 = dma.done.wait [#allocation4], 32  }
  0x24   :  { %111 = vsyncadd [#allocation4], 4294967264 }
  0x25   :  { %58 = vsyncpa [#allocation3], 1 }
  0x26   :  { %59 = vsyncpa [#allocation4], 1 }

</bundles_post_ra>
